<compile_context>
chip_gen: v6e
topology: v6e:2x2x1
jax: 0.10.0
libtpu: 0.0.40
codegen_flags: <defaults>
</compile_context>

<pallas_src>
import jax
import jax.numpy as jnp
from jax.experimental import pallas as pl
from jax.experimental.pallas import tpu as pltpu

# ----------------------------- configuration ------------------------------
B = 2                 # batch
C, H, W = 4, 16, 16   # image channels / spatial (NCHW)
PH = PW = 8           # patch size -> 2x2 = 4 patches
NUM_PATCHES = (H // PH) * (W // PW)
PATCH_DIM = C * PH * PW            # 256 (already a 128-multiple)
DIM_IMG = 64                       # image_encoder.dim_out
VOCAB = 64
SEQ = 8
EMB = 32                           # token embedding width
DIM_LANG = 64                      # lang_encoder dim_out (last_hidden_state width)
DIM_PROJ = 32                      # UNICL_MODEL.DIM_PROJECTION

# TPU-friendly padded shapes: lane (last) dims -> multiples of 128,
# batch/sublane dim -> multiple of 8.
LANE = 128
SUB = 8
B_PAD = ((B + SUB - 1) // SUB) * SUB
DIM_IMG_PAD = ((DIM_IMG + LANE - 1) // LANE) * LANE
DIM_LANG_PAD = ((DIM_LANG + LANE - 1) // LANE) * LANE
EMB_PAD = ((EMB + LANE - 1) // LANE) * LANE
DIM_PROJ_PAD = ((DIM_PROJ + LANE - 1) // LANE) * LANE
EPS = 1e-12


def _vmem_specs(n):
    return [pl.BlockSpec(memory_space=pltpu.MemorySpace.VMEM) for _ in range(n)]


# ------------------------------ Pallas kernels -----------------------------
def _image_encode_kernel(patches_ref, w_patch_ref, b_patch_ref, w_proj_ref, o_ref):
    # patches: [B_PAD, NUM_PATCHES, PATCH_DIM] bf16
    # w_patch: [PATCH_DIM, DIM_IMG_PAD]  bf16, b_patch: [1, DIM_IMG_PAD] f32
    # w_proj : [DIM_IMG_PAD, DIM_PROJ_PAD] bf16
    # Pool BEFORE the matmul (exact: mean(X W + b) == mean(X) W + b).
    pooled = jnp.mean(patches_ref[...].astype(jnp.float32), axis=1)   # [B_PAD, PATCH_DIM]
    h = jnp.dot(pooled.astype(jnp.bfloat16), w_patch_ref[...],
                preferred_element_type=jnp.float32)                   # [B_PAD, DIM_IMG_PAD]
    h = h + b_patch_ref[...]                                          # f32 epilogue, 2D bias add
    y = jnp.dot(h.astype(jnp.bfloat16), w_proj_ref[...],
                preferred_element_type=jnp.float32)                   # [B_PAD, DIM_PROJ_PAD]
    inv = jax.lax.rsqrt(jnp.sum(y * y, axis=-1, keepdims=True) + EPS)
    o_ref[...] = y * inv                                              # unmasked, lane-dense store


def _text_encode_kernel(cls_ref, w_lang_ref, b_lang_ref, w_proj_ref, o_ref):
    # cls   : [B_PAD, EMB_PAD]            bf16 (CLS token only; lang encoder is positionwise)
    # w_lang: [EMB_PAD, DIM_LANG_PAD]     bf16, b_lang: [1, DIM_LANG_PAD] f32
    # w_proj: [DIM_LANG_PAD, DIM_PROJ_PAD] bf16
    h = jnp.dot(cls_ref[...], w_lang_ref[...],
                preferred_element_type=jnp.float32)                   # [B_PAD, DIM_LANG_PAD]
    h = jnp.tanh(h + b_lang_ref[...])                                 # f32 epilogue (EUP tanh)
    y = jnp.dot(h.astype(jnp.bfloat16), w_proj_ref[...],
                preferred_element_type=jnp.float32)                   # [B_PAD, DIM_PROJ_PAD]
    inv = jax.lax.rsqrt(jnp.sum(y * y, axis=-1, keepdims=True) + EPS)
    o_ref[...] = y * inv


# ------------------------------ padding helpers -----------------------------
def _pad2(x, rows, cols, dtype):
    out = jnp.zeros((rows, cols), dtype)
    return out.at[: x.shape[0], : x.shape[1]].set(x.astype(dtype))


def patchify_nchw(image):
    # NCHW -> [B, num_patches, C*PH*PW]
    # TODO(synk): for real image sizes express this gather via a BlockSpec
    # index_map instead of a 6-D transpose in XLA glue.
    b, c, h, w = image.shape
    x = image.reshape(b, c, h // PH, PH, w // PW, PW)
    x = jnp.transpose(x, (0, 2, 4, 1, 3, 5))          # [B, gh, gw, C, PH, PW]
    return x.reshape(b, (h // PH) * (w // PW), c * PH * PW)


# ------------------------------ kernel wrappers -----------------------------
def encode_image(params, image):
    patches = patchify_nchw(image)                                     # [B, P, PATCH_DIM]
    patches_pad = jnp.zeros((B_PAD, NUM_PATCHES, PATCH_DIM), jnp.bfloat16)
    patches_pad = patches_pad.at[:B].set(patches.astype(jnp.bfloat16))

    w_patch = _pad2(params['patch_w'], PATCH_DIM, DIM_IMG_PAD, jnp.bfloat16)
    b_patch = _pad2(params['patch_b'], 1, DIM_IMG_PAD, jnp.float32)
    w_proj = _pad2(params['image_projection'], DIM_IMG_PAD, DIM_PROJ_PAD, jnp.bfloat16)

    out = pl.pallas_call(
        _image_encode_kernel,
        out_shape=jax.ShapeDtypeStruct((B_PAD, DIM_PROJ_PAD), jnp.float32),
        in_specs=_vmem_specs(4),
        out_specs=pl.BlockSpec(memory_space=pltpu.MemorySpace.VMEM),
    )(patches_pad, w_patch, b_patch, w_proj)
    return out[:B, :DIM_PROJ]
    # TODO(synk): norm=False branch of encode_image is not exercised by forward().


def encode_text(params, input_ids):
    # non-clip tokenizer path: last_hidden_state[:, 0]. The synthetic lang
    # encoder (linear + tanh) is positionwise, so computing only the CLS
    # token is exact.
    cls_emb = jnp.take(params['tok_emb'], input_ids[:, 0], axis=0)      # [B, EMB]
    cls_pad = jnp.zeros((B_PAD, EMB_PAD), jnp.bfloat16)
    cls_pad = cls_pad.at[:B, :EMB].set(cls_emb.astype(jnp.bfloat16))

    w_lang = _pad2(params['lang_w'], EMB_PAD, DIM_LANG_PAD, jnp.bfloat16)
    b_lang = _pad2(params['lang_b'], 1, DIM_LANG_PAD, jnp.float32)
    w_proj = _pad2(params['lang_projection'], DIM_LANG_PAD, DIM_PROJ_PAD, jnp.bfloat16)

    out = pl.pallas_call(
        _text_encode_kernel,
        out_shape=jax.ShapeDtypeStruct((B_PAD, DIM_PROJ_PAD), jnp.float32),
        in_specs=_vmem_specs(4),
        out_specs=pl.BlockSpec(memory_space=pltpu.MemorySpace.VMEM),
    )(cls_pad, w_lang, b_lang, w_proj)
    return out[:B, :DIM_PROJ]
    # TODO(synk): clip-tokenizer path (argmax(input_ids) gather) not exercised here.


# ------------------------------ parameter init ------------------------------
def init_params(key):
    ks = jax.random.split(key, 7)
    params = {
        # synthetic image encoder (patch embedding)
        'patch_w': 0.02 * jax.random.normal(ks[0], (PATCH_DIM, DIM_IMG), jnp.float32),
        'patch_b': jnp.zeros((1, DIM_IMG), jnp.float32),
        # synthetic lang encoder (token embedding + linear)
        'tok_emb': 0.02 * jax.random.normal(ks[1], (VOCAB, EMB), jnp.float32),
        'lang_w': 0.02 * jax.random.normal(ks[2], (EMB, DIM_LANG), jnp.float32),
        'lang_b': jnp.zeros((1, DIM_LANG), jnp.float32),
        # UniCLModel parameters (trunc_normal_(std=0.02) approximated by normal)
        'image_projection': 0.02 * jax.random.normal(ks[3], (DIM_IMG, DIM_PROJ), jnp.float32),
        'lang_projection': 0.02 * jax.random.normal(ks[4], (DIM_LANG, DIM_PROJ), jnp.float32),
        'logit_scale': jnp.ones((), jnp.float32),
    }
    return params


# ------------------------------ forward pass --------------------------------
def unicl_forward(params, image, input_ids):
    features_image = encode_image(params, image)
    features_text = encode_text(params, input_ids)
    T = jnp.exp(params['logit_scale'])
    return features_image, features_text, T


# ---------------------------------- main -------------------------------------
if __name__ == "__main__":
    key = jax.random.PRNGKey(0)
    k_img, k_txt, k_par = jax.random.split(key, 3)

    image = jax.random.normal(k_img, (B, C, H, W), jnp.float32)         # NCHW
    input_ids = jax.random.randint(k_txt, (B, SEQ), 0, VOCAB, jnp.int32)
    params = init_params(k_par)

    feats_img, feats_txt, T = jax.jit(unicl_forward)(params, image, input_ids)
    jax.block_until_ready((feats_img, feats_txt, T))

    assert feats_img.shape == (B, DIM_PROJ)
    assert feats_txt.shape == (B, DIM_PROJ)
    # rows are L2-normalised
    assert jnp.allclose(jnp.linalg.norm(feats_img, axis=-1), 1.0, atol=1e-4)
    assert jnp.allclose(jnp.linalg.norm(feats_txt, axis=-1), 1.0, atol=1e-4)
    assert jnp.allclose(T, jnp.exp(jnp.float32(1.0)))
    assert bool(jnp.all(jnp.isfinite(feats_img))) and bool(jnp.all(jnp.isfinite(feats_txt)))

    print("KERNEL_OK")
</pallas_src>

<mosaic_0001>
module attributes {stable_mosaic.version = 11 : i64} {
  func.func @_image_encode_kernel(%arg0: memref<8x4x256xbf16, #tpu.memory_space<vmem>>, %arg1: memref<256x128xbf16, #tpu.memory_space<vmem>>, %arg2: memref<1x128xf32, #tpu.memory_space<vmem>>, %arg3: memref<128x128xbf16, #tpu.memory_space<vmem>>, %arg4: memref<8x128xf32, #tpu.memory_space<vmem>>) attributes {dimension_semantics = [], scalar_prefetch = 0 : i64, scratch_operands = 0 : i64, tpu.core_type = #tpu.core_type<tc>} {
    %c0 = arith.constant 0 : index
    %c0_0 = arith.constant 0 : index
    %c0_1 = arith.constant 0 : index
    %0 = vector.load %arg0[%c0, %c0_0, %c0_1] : memref<8x4x256xbf16, #tpu.memory_space<vmem>>, vector<8x4x256xbf16>
    %1 = arith.extf %0 : vector<8x4x256xbf16> to vector<8x4x256xf32>
    %cst = arith.constant dense<0.000000e+00> : vector<8x256xf32>
    %2 = vector.multi_reduction <add>, %1, %cst [1] : vector<8x4x256xf32> to vector<8x256xf32>
    %cst_2 = arith.constant 4.000000e+00 : f32
    %3 = vector.broadcast %cst_2 : f32 to vector<8x256xf32>
    %4 = arith.divf %2, %3 : vector<8x256xf32>
    %5 = arith.truncf %4 : vector<8x256xf32> to vector<8x256xbf16>
    %c0_3 = arith.constant 0 : index
    %c0_4 = arith.constant 0 : index
    %6 = vector.load %arg1[%c0_3, %c0_4] : memref<256x128xbf16, #tpu.memory_space<vmem>>, vector<256x128xbf16>
    %cst_5 = arith.constant dense<0.000000e+00> : vector<8x128xf32>
    %7 = tpu.matmul %5, %6, %cst_5 {dimension_numbers = #tpu.dot_dimension_numbers<[1], [0], [0], [1], [0, 0, 1, 1], [], []>} : vector<8x256xbf16>, vector<256x128xbf16>, vector<8x128xf32> -> vector<8x128xf32>
    %c0_6 = arith.constant 0 : index
    %c0_7 = arith.constant 0 : index
    %8 = vector.load %arg2[%c0_6, %c0_7] : memref<1x128xf32, #tpu.memory_space<vmem>>, vector<1x128xf32>
    %9 = vector.broadcast %8 : vector<1x128xf32> to vector<8x128xf32>
    %10 = arith.addf %7, %9 : vector<8x128xf32>
    %11 = arith.truncf %10 : vector<8x128xf32> to vector<8x128xbf16>
    %c0_8 = arith.constant 0 : index
    %c0_9 = arith.constant 0 : index
    %12 = vector.load %arg3[%c0_8, %c0_9] : memref<128x128xbf16, #tpu.memory_space<vmem>>, vector<128x128xbf16>
    %cst_10 = arith.constant dense<0.000000e+00> : vector<8x128xf32>
    %13 = tpu.matmul %11, %12, %cst_10 {dimension_numbers = #tpu.dot_dimension_numbers<[1], [0], [0], [1], [0, 0, 1, 1], [], []>} : vector<8x128xbf16>, vector<128x128xbf16>, vector<8x128xf32> -> vector<8x128xf32>
    %14 = arith.mulf %13, %13 : vector<8x128xf32>
    %cst_11 = arith.constant dense<0.000000e+00> : vector<8xf32>
    %15 = vector.multi_reduction <add>, %14, %cst_11 [1] : vector<8x128xf32> to vector<8xf32>
    %16 = vector.shape_cast %15 : vector<8xf32> to vector<8x1xf32>
    %cst_12 = arith.constant 9.99999996E-13 : f32
    %17 = vector.broadcast %cst_12 : f32 to vector<8x1xf32>
    %18 = arith.addf %16, %17 : vector<8x1xf32>
    %19 = math.rsqrt %18 : vector<8x1xf32>
    %20 = vector.broadcast %19 : vector<8x1xf32> to vector<8x128xf32>
    %21 = arith.mulf %13, %20 : vector<8x128xf32>
    %c0_13 = arith.constant 0 : index
    %c0_14 = arith.constant 0 : index
    %22 = vector.load %arg4[%c0_13, %c0_14] : memref<8x128xf32, #tpu.memory_space<vmem>>, vector<8x128xf32>
    tpu.vector_store %arg4[%c0_13, %c0_14], %21 {strides = array<i32>} : memref<8x128xf32, #tpu.memory_space<vmem>>, vector<8x128xf32>,
    return
  }
}

module attributes {stable_mosaic.version = 11 : i64} {
  func.func @_text_encode_kernel(%arg0: memref<8x128xbf16, #tpu.memory_space<vmem>>, %arg1: memref<128x128xbf16, #tpu.memory_space<vmem>>, %arg2: memref<1x128xf32, #tpu.memory_space<vmem>>, %arg3: memref<128x128xbf16, #tpu.memory_space<vmem>>, %arg4: memref<8x128xf32, #tpu.memory_space<vmem>>) attributes {dimension_semantics = [], scalar_prefetch = 0 : i64, scratch_operands = 0 : i64, tpu.core_type = #tpu.core_type<tc>} {
    %c0 = arith.constant 0 : index
    %c0_0 = arith.constant 0 : index
    %0 = vector.load %arg0[%c0, %c0_0] : memref<8x128xbf16, #tpu.memory_space<vmem>>, vector<8x128xbf16>
    %c0_1 = arith.constant 0 : index
    %c0_2 = arith.constant 0 : index
    %1 = vector.load %arg1[%c0_1, %c0_2] : memref<128x128xbf16, #tpu.memory_space<vmem>>, vector<128x128xbf16>
    %cst = arith.constant dense<0.000000e+00> : vector<8x128xf32>
    %2 = tpu.matmul %0, %1, %cst {dimension_numbers = #tpu.dot_dimension_numbers<[1], [0], [0], [1], [0, 0, 1, 1], [], []>} : vector<8x128xbf16>, vector<128x128xbf16>, vector<8x128xf32> -> vector<8x128xf32>
    %c0_3 = arith.constant 0 : index
    %c0_4 = arith.constant 0 : index
    %3 = vector.load %arg2[%c0_3, %c0_4] : memref<1x128xf32, #tpu.memory_space<vmem>>, vector<1x128xf32>
    %4 = vector.broadcast %3 : vector<1x128xf32> to vector<8x128xf32>
    %5 = arith.addf %2, %4 : vector<8x128xf32>
    %6 = math.tanh %5 : vector<8x128xf32>
    %7 = arith.truncf %6 : vector<8x128xf32> to vector<8x128xbf16>
    %c0_5 = arith.constant 0 : index
    %c0_6 = arith.constant 0 : index
    %8 = vector.load %arg3[%c0_5, %c0_6] : memref<128x128xbf16, #tpu.memory_space<vmem>>, vector<128x128xbf16>
    %cst_7 = arith.constant dense<0.000000e+00> : vector<8x128xf32>
    %9 = tpu.matmul %7, %8, %cst_7 {dimension_numbers = #tpu.dot_dimension_numbers<[1], [0], [0], [1], [0, 0, 1, 1], [], []>} : vector<8x128xbf16>, vector<128x128xbf16>, vector<8x128xf32> -> vector<8x128xf32>
    %10 = arith.mulf %9, %9 : vector<8x128xf32>
    %cst_8 = arith.constant dense<0.000000e+00> : vector<8xf32>
    %11 = vector.multi_reduction <add>, %10, %cst_8 [1] : vector<8x128xf32> to vector<8xf32>
    %12 = vector.shape_cast %11 : vector<8xf32> to vector<8x1xf32>
    %cst_9 = arith.constant 9.99999996E-13 : f32
    %13 = vector.broadcast %cst_9 : f32 to vector<8x1xf32>
    %14 = arith.addf %12, %13 : vector<8x1xf32>
    %15 = math.rsqrt %14 : vector<8x1xf32>
    %16 = vector.broadcast %15 : vector<8x1xf32> to vector<8x128xf32>
    %17 = arith.mulf %9, %16 : vector<8x128xf32>
    %c0_10 = arith.constant 0 : index
    %c0_11 = arith.constant 0 : index
    %18 = vector.load %arg4[%c0_10, %c0_11] : memref<8x128xf32, #tpu.memory_space<vmem>>, vector<8x128xf32>
    tpu.vector_store %arg4[%c0_10, %c0_11], %17 {strides = array<i32>} : memref<8x128xf32, #tpu.memory_space<vmem>>, vector<8x128xf32>,
    return
  }
}

</mosaic_0001>

<bundles_post_ra>
// kernel: unicl_forward.3
= control target key start
LH: loop header
LB: loop body
LE: loop exit
PB: predicated region body
PF: predicated region fallthrough
CT: control target
= control target key end

     0   :  { %v344_v0 = vmov 0.0   ;;  %vm345_vm0 = vmmov 0   ;;  %s428_s1 = inlined_call_operand.vmem [shape: bf16[128,128], index: 1, kind: input, shape index: {}]   ;;  %s429_s3 = inlined_call_operand.vmem [shape: bf16[128,128], index: 3, kind: input, shape index: {}]   ;;  %s430_s0 = inlined_call_operand.vmem [shape: bf16[8,128], index: 0, kind: input, shape index: {}]   ;;  %s431_s2 = inlined_call_operand.vmem [shape: f32[1,128], index: 2, kind: input, shape index: {}]   ;;  %s432_s4 = inlined_call_operand.vmem [shape: f32[8,128], index: 4, kind: output, shape index: {}]  }
   0x1   :  { %282 = vmatprep.subr.bf16.mxu0 %v344_v0  ;;  %v324_v1 = vld [vmem:[%s428_s1 + $0x38] sm:$0xff]   ;;  %298 = vmatprep.mubr.msk.bf16.mxu0 %vm345_vm0, %v344_v0  ;;  %v325_v2 = vld [vmem:[%s428_s1 + $0x30] sm:$0xff]   ;;  %v326_v3 = vld [vmem:[%s428_s1 + $0x28] sm:$0xff]  }
   0x2   :  { %302 = vmatprep.subr.bf16.mxu1 %v344_v0  ;;  %318 = vmatprep.mubr.msk.bf16.mxu1 %vm345_vm0, %v344_v0  ;;  %v332_v4 = vld [vmem:[%s429_s3 + $0x38] sm:$0xff]   ;;  %v327_v5 = vld [vmem:[%s428_s1 + $0x20] sm:$0xff]   ;;  %v333_v6 = vld [vmem:[%s429_s3 + $0x30] sm:$0xff]  }
   0x3   :  { %283 = vmatpush3.bf16.msra.mxu0 %v324_v1  ;;  %303 = vmatpush3.bf16.msra.mxu1 %v332_v4  ;;  %v328_v7 = vld [vmem:[%s428_s1 + $0x18] sm:$0xff]   ;;  %v334_v8 = vld [vmem:[%s429_s3 + $0x28] sm:$0xff]   ;;  %v329_v9 = vld [vmem:[%s428_s1 + $0x10] sm:$0xff]  }
   0x4   :  { %284 = vmatprep.subr.bf16.mxu0 %v344_v0  ;;  %304 = vmatprep.subr.bf16.mxu1 %v344_v0  ;;  %v330_v10 = vld [vmem:[%s428_s1 + $0x8] sm:$0xff]   ;;  %v331_v11 = vld [vmem:[%s428_s1] sm:$0xff]   ;;  %v336_v14 = vld [vmem:[%s429_s3 + $0x18] sm:$0xff]  }
   0x5   :  { %v18_v12 = vld [vmem:[%s430_s0] sm:$0xf]  ;;  %v337_v15 = vld [vmem:[%s429_s3 + $0x10] sm:$0xff]   ;;  %v338_v16 = vld [vmem:[%s429_s3 + $0x8] sm:$0xff]  }
   0x6   :  { %v335_v13 = vld [vmem:[%s429_s3 + $0x20] sm:$0xff]  }
   0x7   :  { %285 = vmatpush3.bf16.msra.mxu0 %v325_v2  ;;  %305 = vmatpush3.bf16.msra.mxu1 %v333_v6  ;;  %v339_v17 = vld [vmem:[%s429_s3] sm:$0xff]  }
   0x8   :  { %286 = vmatprep.subr.bf16.mxu0 %v344_v0  ;;  %306 = vmatprep.subr.bf16.mxu1 %v344_v0  ;;  %v247_v18 = vld [vmem:[%s431_s2] ss:$0 sm:$0xff] }
   0xb   :  { %287 = vmatpush3.bf16.msra.mxu0 %v326_v3  ;;  %307 = vmatpush3.bf16.msra.mxu1 %v334_v8 }
   0xc   :  { %288 = vmatprep.subr.bf16.mxu0 %v344_v0  ;;  %308 = vmatprep.subr.bf16.mxu1 %v344_v0 }
   0xf   :  { %289 = vmatpush3.bf16.msra.mxu0 %v327_v5  ;;  %309 = vmatpush3.bf16.msra.mxu1 %v335_v13 }
  0x10   :  { %290 = vmatprep.subr.bf16.mxu0 %v344_v0  ;;  %310 = vmatprep.subr.bf16.mxu1 %v344_v0 }
  0x13   :  { %291 = vmatpush3.bf16.msra.mxu0 %v328_v7  ;;  %311 = vmatpush3.bf16.msra.mxu1 %v336_v14 }
  0x14   :  { %292 = vmatprep.subr.bf16.mxu0 %v344_v0  ;;  %312 = vmatprep.subr.bf16.mxu1 %v344_v0 }
  0x17   :  { %293 = vmatpush3.bf16.msra.mxu0 %v329_v9  ;;  %313 = vmatpush3.bf16.msra.mxu1 %v337_v15 }
  0x18   :  { %294 = vmatprep.subr.bf16.mxu0 %v344_v0  ;;  %314 = vmatprep.subr.bf16.mxu1 %v344_v0 }
  0x1b   :  { %295 = vmatpush3.bf16.msra.mxu0 %v330_v10  ;;  %315 = vmatpush3.bf16.msra.mxu1 %v338_v16 }
  0x1c   :  { %296 = vmatprep.subr.bf16.mxu0 %v344_v0  ;;  %316 = vmatprep.subr.bf16.mxu1 %v344_v0 }
  0x1f   :  { %297 = vmatpush3.bf16.msra.mxu0 %v331_v11  ;;  %317 = vmatpush3.bf16.msra.mxu1 %v339_v17 }
  0x22   :  { %299 = vmatmul.mubr.bf16.vlgmr.msra.gmra.mxu0 %v18_v12 }
  0xe2   :  { %v124_v19 = vpop.f32.mrf.mxu0 }
  0xe3   :  { %v125_v20 = vadd.f32 %v247_v18, %v124_v19 }
  0xe4   :  { %v300_v21 = vpop.f32.mrf.mxu0 }
  0xe5   :  { %340 = vtanh.f32 %v125_v20 }
  0xe6   :  { %v127_v22 = vpop.f32.mrf.mxu0 }
  0xe8   :  { %v301_v23 = vpop.f32.mrf.mxu0 }
  0xf2   :  { %v341_v24 = vpop.eup %340 }
  0xf3   :  { %v131_v25 = vpack.c.bf16 %v341_v24, %v341_v24 }
  0xf5   :  { %319 = vmatmul.mubr.bf16.vlgmr.msra.gmra.mxu1 %v131_v25 }
 0x1b5   :  { %v230_v26 = vpop.f32.mrf.mxu1 }
 0x1b6   :  { %v236_v27 = vmul.f32 %v230_v26, %v230_v26 }
 0x1b7   :  { %v320_v28 = vpop.f32.mrf.mxu1 }
 0x1b8   :  { %237 = vadd.xlane.f32.xlu0 %v236_v27 }
 0x1b9   :  { %v233_v29 = vpop.f32.mrf.mxu1 }
 0x1bb   :  { %v321_v30 = vpop.f32.mrf.mxu1 }
 0x241   :  { %v238_v31 = vpop.xlane.xlu0 %237 }
 0x242   :  { %v239_v32 = vadd.f32 1e-12, %v238_v31 }
 0x244   :  { %342 = vrsqrt.f32 %v239_v32 }
 0x251   :  { %v343_v33 = vpop.eup %342 }
 0x252   :  { %v241_v34 = vmul.f32 %v343_v33, %v230_v26 }
 0x254   :  { %242 = vst [vmem:[%s432_s4] sm:$0xff] %v241_v34 }

// kernel: unicl_forward.2
= control target key start
LH: loop header
LB: loop body
LE: loop exit
PB: predicated region body
PF: predicated region fallthrough
CT: control target
= control target key end

     0   :  { %v675_v5 = vmov 0.0   ;;  %vm58_vm0 = vcmask 1043456   ;;  %vm275_vm1 = vcmask 1041409   ;;  %vm277_vm2 = vcmask 1042434   ;;  %s873_s1 = inlined_call_operand.vmem [shape: bf16[256,128], index: 1, kind: input, shape index: {}]   ;;  %s874_s0 = inlined_call_operand.vmem [shape: bf16[8,4,256], index: 0, kind: input, shape index: {}]   ;;  %s875_s3 = inlined_call_operand.vmem [shape: bf16[128,128], index: 3, kind: input, shape index: {}]   ;;  %s876_s2 = inlined_call_operand.vmem [shape: f32[1,128], index: 2, kind: input, shape index: {}]   ;;  %s877_s4 = inlined_call_operand.vmem [shape: f32[8,128], index: 4, kind: output, shape index: {}]  }
   0x1   :  { %v649_v0 = vld [vmem:[%s873_s1 + $0x78] sm:$0xff]   ;;  %v651_v2 = vld [vmem:[%s873_s1 + $0x70] sm:$0xff]   ;;  %v653_v4 = vld [vmem:[%s873_s1 + $0x68] sm:$0xff]   ;;  %627 = vmatprep.subr.bf16.mxu1 %v675_v5  ;;  %vm279_vm3 = vcmask 1043459   ;;  %vm281_vm4 = vcmask 1044484   ;;  %vm283_vm5 = vcmask 1045509  }
   0x2   :  { %v650_v1 = vld [vmem:[%s873_s1 + $0x38] sm:$0xff]   ;;  %596 = vmatprep.subr.bf16.mxu0 %v649_v0  ;;  %v652_v3 = vld [vmem:[%s873_s1 + $0x30] sm:$0xff]   ;;  %v654_v6 = vld [vmem:[%s873_s1 + $0x28] sm:$0xff]   ;;  %vm285_vm6 = vcmask 1046534   ;;  %vm287_vm7 = vcmask 1047559   ;;  %vm676_vm8 = vmmov 0  }
   0x3   :  { %597 = vmatpush3.bf16.msra.mxu0 %v650_v1  ;;  %v655_v7 = vld [vmem:[%s873_s1 + $0x60] sm:$0xff]   ;;  %v657_v9 = vld [vmem:[%s873_s1 + $0x58] sm:$0xff]   ;;  %v659_v11 = vld [vmem:[%s873_s1 + $0x50] sm:$0xff]   ;;  %643 = vmatprep.mubr.msk.bf16.mxu1 %vm676_vm8, %v675_v5 }
   0x4   :  { %598 = vmatprep.subr.bf16.mxu0 %v651_v2  ;;  %v656_v8 = vld [vmem:[%s873_s1 + $0x20] sm:$0xff]   ;;  %v658_v10 = vld [vmem:[%s873_s1 + $0x18] sm:$0xff]   ;;  %v593_v13 = vld [vmem:[%s874_s0 + $0x8] sm:$0xff]  }
   0x5   :  { %v578_v12 = vld [vmem:[%s874_s0] sm:$0xff]   ;;  %v594_v14 = vld [vmem:[%s874_s0 + $0x10] sm:$0xff]   ;;  %v745_v17 = vunpack.c.l.bf16 %v593_v13  ;;  %v747_v18 = vunpack.c.h.bf16 %v593_v13  ;;  %v595_v19 = vld [vmem:[%s874_s0 + $0x18] sm:$0xff]  }
   0x6   :  { %v579_v15 = vunpack.c.l.bf16 %v578_v12  ;;  %v580_v16 = vunpack.c.h.bf16 %v578_v12  ;;  %v752_v20 = vunpack.c.l.bf16 %v594_v14  ;;  %v754_v21 = vunpack.c.h.bf16 %v594_v14  ;;  %v665_v24 = vld [vmem:[%s875_s3 + $0x38] sm:$0xff]   ;;  %v660_v25 = vld [vmem:[%s873_s1 + $0x10] sm:$0xff]   ;;  %v661_v30 = vld [vmem:[%s873_s1 + $0x48] sm:$0xff]  }
   0x7   :  { %599 = vmatpush3.bf16.msra.mxu0 %v652_v3  ;;  %v756_v22 = vunpack.c.l.bf16 %v595_v19  ;;  %v758_v23 = vunpack.c.h.bf16 %v595_v19  ;;  %v44_v28 = vcombine.high %v745_v17, %v745_v17  ;;  %v45_v29 = vcombine.high %v747_v18, %v747_v18  ;;  %v662_v35 = vld [vmem:[%s873_s1 + $0x8] sm:$0xff]   ;;  %628 = vmatpush3.bf16.msra.mxu1 %v665_v24  ;;  %v666_v40 = vld [vmem:[%s875_s3 + $0x30] sm:$0xff]   ;;  %v663_v41 = vld [vmem:[%s873_s1 + $0x40] sm:$0xff]  }
   0x8   :  { %600 = vmatprep.subr.bf16.mxu0 %v653_v4  ;;  %v42_v26 = vcombine.high %v579_v15, %v579_v15  ;;  %v43_v27 = vcombine.high %v580_v16, %v580_v16  ;;  %v46_v31 = vcombine.high %v752_v20, %v752_v20  ;;  %v47_v32 = vcombine.high %v754_v21, %v754_v21  ;;  %v664_v54 = vld [vmem:[%s873_s1] sm:$0xff]   ;;  %v667_v59 = vld [vmem:[%s875_s3 + $0x28] sm:$0xff]  }
   0x9   :  { %v48_v33 = vcombine.high %v756_v22, %v756_v22  ;;  %v49_v34 = vcombine.high %v758_v23, %v758_v23  ;;  %v785_v36 = vsel %vm58_vm0, %v579_v15, 0.0  ;;  %v789_v38 = vsel %vm58_vm0, %v580_v16, 0.0  ;;  %629 = vmatprep.subr.bf16.mxu1 %v675_v5  ;;  %v668_v13 = vld [vmem:[%s875_s3 + $0x20] sm:$0xff]  }
   0xa   :  { %v66_v37 = vsel %vm58_vm0, %v42_v26, 0.0  ;;  %v80_v39 = vsel %vm58_vm0, %v43_v27, 0.0  ;;  %v60_v42 = vrot.slane %v785_v36, 4  ;;  %v74_v44 = vrot.slane %v789_v38, 4 }
   0xb   :  { %601 = vmatpush3.bf16.msra.mxu0 %v654_v6  ;;  %v67_v43 = vrot.slane %v66_v37, 4  ;;  %v81_v45 = vrot.slane %v80_v39, 4  ;;  %v94_v46 = vsel %vm58_vm0, %v44_v28, 0.0  ;;  %v108_v47 = vsel %vm58_vm0, %v45_v29, 0.0  ;;  %630 = vmatpush3.bf16.msra.mxu1 %v666_v40 }
   0xc   :  { %602 = vmatprep.subr.bf16.mxu0 %v655_v7  ;;  %v122_v48 = vsel %vm58_vm0, %v46_v31, 0.0  ;;  %v136_v49 = vsel %vm58_vm0, %v47_v32, 0.0  ;;  %v95_v52 = vrot.slane %v94_v46, 4  ;;  %v109_v53 = vrot.slane %v108_v47, 4  ;;  %631 = vmatprep.subr.bf16.mxu1 %v675_v5 }
   0xd   :  { %v68_v50 = vadd.f32 %v67_v43, %v66_v37  ;;  %v82_v51 = vadd.f32 %v81_v45, %v80_v39  ;;  %v123_v55 = vrot.slane %v122_v48, 4  ;;  %v137_v56 = vrot.slane %v136_v49, 4  ;;  %v669_v37 = vld [vmem:[%s875_s3 + $0x18] sm:$0xff]  }
   0xe   :  { %v150_v57 = vsel %vm58_vm0, %v48_v33, 0.0  ;;  %v164_v58 = vsel %vm58_vm0, %v49_v34, 0.0  ;;  %v96_v62 = vadd.f32 %v95_v52, %v94_v46  ;;  %v110_v63 = vadd.f32 %v109_v53, %v108_v47 }
   0xf   :  { %603 = vmatpush3.bf16.msra.mxu0 %v656_v8  ;;  %v69_v60 = vrot.slane %v68_v50, 2  ;;  %v83_v61 = vrot.slane %v82_v51, 2  ;;  %v124_v0 = vadd.f32 %v123_v55, %v122_v48  ;;  %v138_v1 = vadd.f32 %v137_v56, %v136_v49  ;;  %632 = vmatpush3.bf16.msra.mxu1 %v667_v59 }
  0x10   :  { %604 = vmatprep.subr.bf16.mxu0 %v657_v9  ;;  %v151_v2 = vrot.slane %v150_v57, 4  ;;  %v165_v3 = vrot.slane %v164_v58, 4  ;;  %v97_v7 = vrot.slane %v96_v62, 2  ;;  %v111_v8 = vrot.slane %v110_v63, 2  ;;  %633 = vmatprep.subr.bf16.mxu1 %v675_v5 }
  0x11   :  { %v70_v4 = vadd.f32 %v69_v60, %v68_v50  ;;  %v84_v6 = vadd.f32 %v83_v61, %v82_v51  ;;  %v125_v9 = vrot.slane %v124_v0, 2 }
  0x12   :  { %v166_v12 = vadd.f32 %v165_v3, %v164_v58  ;;  %v98_v16 = vadd.f32 %v97_v7, %v96_v62  ;;  %v112_v19 = vadd.f32 %v111_v8, %v110_v63 }
  0x13   :  { %605 = vmatpush3.bf16.msra.mxu0 %v658_v10  ;;  %v139_v10 = vrot.slane %v138_v1, 2  ;;  %v71_v14 = vrot.slane %v70_v4, 1  ;;  %v85_v15 = vrot.slane %v84_v6, 1  ;;  %v126_v24 = vadd.f32 %v125_v9, %v124_v0  ;;  %634 = vmatpush3.bf16.msra.mxu1 %v668_v13 }
  0x14   :  { %606 = vmatprep.subr.bf16.mxu0 %v659_v11  ;;  %v152_v11 = vadd.f32 %v151_v2, %v150_v57  ;;  %v167_v27 = vrot.slane %v166_v12, 2  ;;  %v113_v31 = vrot.slane %v112_v19, 1  ;;  %635 = vmatprep.subr.bf16.mxu1 %v675_v5  ;;  %v670_v57 = vld [vmem:[%s875_s3 + $0x10] sm:$0xff]   ;;  %v75_v13 = vadd.f32 %v74_v44, %v789_v38 }
  0x15   :  { %v72_v28 = vadd.f32 %v71_v14, %v70_v4  ;;  %v86_v29 = vadd.f32 %v85_v15, %v84_v6  ;;  %v127_v32 = vrot.slane %v126_v24, 1  ;;  %v61_v6 = vadd.f32 %v60_v42, %v785_v36 }
  0x16   :  { %v153_v26 = vrot.slane %v152_v11, 2  ;;  %v114_v40 = vadd.f32 %v113_v31, %v112_v19  ;;  %v87_v14 = vsel %vm58_vm0, %v745_v17, 0.0  ;;  %v115_v17 = vsel %vm58_vm0, %v752_v20, 0.0 }
  0x17   :  { %607 = vmatpush3.bf16.msra.mxu0 %v660_v25  ;;  %v140_v25 = vadd.f32 %v139_v10, %v138_v1  ;;  %v175_v43 = vmul.f32 0.25, %v86_v29  ;;  %v128_v45 = vadd.f32 %v127_v32, %v126_v24  ;;  %636 = vmatpush3.bf16.msra.mxu1 %v669_v37  ;;  %v88_v42 = vrot.slane %v87_v14, 4 }
  0x18   :  { %608 = vmatprep.subr.bf16.mxu0 %v661_v30  ;;  %v99_v30 = vrot.slane %v98_v16, 1  ;;  %v154_v34 = vadd.f32 %v153_v26, %v152_v11  ;;  %v179_v50 = vmul.f32 0.25, %v114_v40  ;;  %637 = vmatprep.subr.bf16.mxu1 %v675_v5  ;;  %v101_v26 = vsel %vm58_vm0, %v747_v18, 0.0 }
  0x19   :  { %v141_v33 = vrot.slane %v140_v25, 1  ;;  %v191_v52 = vpack.c.bf16 %v175_v43, %v175_v43  ;;  %v181_v55 = vmul.f32 0.25, %v128_v45  ;;  %v89_v38 = vadd.f32 %v88_v42, %v87_v14 }
  0x1a   :  { %v100_v39 = vadd.f32 %v99_v30, %v98_v16  ;;  %v155_v47 = vrot.slane %v154_v34, 1  ;;  %v195_v59 = vpack.c.bf16 %v179_v50, %v179_v50  ;;  %v102_v44 = vrot.slane %v101_v26, 4 }
  0x1b   :  { %609 = vmatpush3.bf16.msra.mxu0 %v662_v35  ;;  %v168_v35 = vadd.f32 %v167_v27, %v166_v12  ;;  %v142_v46 = vadd.f32 %v141_v33, %v140_v25  ;;  %v262_v61 = vunpack.c.l.b16 %v191_v52  ;;  %v197_v0 = vpack.c.bf16 %v181_v55, %v181_v55  ;;  %638 = vmatpush3.bf16.msra.mxu1 %v670_v57 }
  0x1c   :  { %610 = vmatprep.subr.bf16.mxu0 %v663_v41  ;;  %v173_v41 = vmul.f32 0.25, %v72_v28  ;;  %v177_v49 = vmul.f32 0.25, %v100_v39  ;;  %v156_v53 = vadd.f32 %v155_v47, %v154_v34  ;;  %v266_v3 = vunpack.c.l.b16 %v195_v59  ;;  %639 = vmatprep.subr.bf16.mxu1 %v675_v5 }
  0x1d   :  { %v169_v48 = vrot.slane %v168_v35, 1  ;;  %v183_v56 = vmul.f32 0.25, %v142_v46  ;;  %v268_v9 = vunpack.c.l.b16 %v197_v0  ;;  %v62_v12 = vrot.slane %v61_v6, 2 }
  0x1e   :  { %v189_v51 = vpack.c.bf16 %v173_v41, %v173_v41  ;;  %v193_v58 = vpack.c.bf16 %v177_v49, %v177_v49  ;;  %v185_v62 = vmul.f32 0.25, %v156_v53  ;;  %v76_v25 = vrot.slane %v75_v13, 2 }
  0x1f   :  { %611 = vmatpush3.bf16.msra.mxu0 %v664_v54  ;;  %v170_v54 = vadd.f32 %v169_v48, %v168_v35  ;;  %v199_v1 = vpack.c.bf16 %v183_v56, %v183_v56  ;;  %v63_v24 = vadd.f32 %v62_v12, %v61_v6  ;;  %v116_v31 = vrot.slane %v115_v17, 4 }
  0x20   :  { %v260_v60 = vunpack.c.l.b16 %v189_v51  ;;  %v264_v2 = vunpack.c.l.b16 %v193_v58  ;;  %v201_v7 = vpack.c.bf16 %v185_v62, %v185_v62  ;;  %v77_v30 = vadd.f32 %v76_v25, %v75_v13 }
  0x21   :  { %v187_v63 = vmul.f32 0.25, %v170_v54  ;;  %v270_v10 = vunpack.c.l.b16 %v199_v1  ;;  %v64_v29 = vrot.slane %v63_v24, 1  ;;  %v90_v33 = vrot.slane %v89_v38, 2 }
  0x22   :  { %v289_v4 = vsel %vm275_vm1, %v262_v61, %v260_v60  ;;  %v272_v15 = vunpack.c.l.b16 %v201_v7  ;;  %v103_v34 = vadd.f32 %v102_v44, %v101_v26  ;;  %v129_v35 = vsel %vm58_vm0, %v754_v21, 0.0 }
  0x23   :  { %v203_v8 = vpack.c.bf16 %v187_v63, %v187_v63  ;;  %v290_v11 = vsel %vm277_vm2, %v264_v2, %v289_v4  ;;  %v65_v37 = vadd.f32 %v64_v29, %v63_v24  ;;  %v78_v39 = vrot.slane %v77_v30, 1 }
  0x24   :  { %v291_v36 = vsel %vm279_vm3, %v266_v3, %v290_v11  ;;  %v117_v40 = vadd.f32 %v116_v31, %v115_v17  ;;  %v91_v41 = vadd.f32 %v90_v33, %v89_v38  ;;  %v104_v43 = vrot.slane %v103_v34, 2 }
  0x25   :  { %v274_v16 = vunpack.c.l.b16 %v203_v8  ;;  %v292_v19 = vsel %vm281_vm4, %v268_v9, %v291_v36  ;;  %v130_v45 = vrot.slane %v129_v35, 4  ;;  %v143_v20 = vsel %vm58_vm0, %v756_v22, 0.0 }
  0x26   :  { %v293_v27 = vsel %vm283_vm5, %v270_v10, %v292_v19  ;;  %v79_v46 = vadd.f32 %v78_v39, %v77_v30  ;;  %v118_v47 = vrot.slane %v117_v40, 2  ;;  %v144_v48 = vrot.slane %v143_v20, 4 }
  0x27   :  { %v294_v28 = vsel %vm285_vm6, %v272_v15, %v293_v27  ;;  %v157_v49 = vsel %vm58_vm0, %v758_v23, 0.0  ;;  %v92_v50 = vrot.slane %v91_v41, 1  ;;  %v105_v51 = vadd.f32 %v104_v43, %v103_v34  ;;  %v671_v43 = vld [vmem:[%s875_s3 + $0x8] sm:$0xff]  }
  0x28   :  { %v295_v32 = vsel %vm287_vm7, %v274_v16, %v294_v28  ;;  %v131_v21 = vadd.f32 %v130_v45, %v129_v35  ;;  %v158_v52 = vrot.slane %v157_v49, 4  ;;  %v119_v53 = vadd.f32 %v118_v47, %v117_v40  ;;  %640 = vmatpush3.bf16.msra.mxu1 %v671_v43  ;;  %v672_v45 = vld [vmem:[%s875_s3] sm:$0xff]  }
  0x29   :  { %v297_v18 = vpack.c.b16 %v295_v32, %v295_v32  ;;  %v145_v54 = vadd.f32 %v144_v48, %v143_v20  ;;  %v172_v55 = vmul.f32 0.25, %v65_v37  ;;  %v174_v56 = vmul.f32 0.25, %v79_v46  ;;  %641 = vmatprep.subr.bf16.mxu1 %v675_v5  ;;  %v552_v46 = vld [vmem:[%s876_s2] ss:$0 sm:$0xff] }
  0x2a   :  { %v93_v57 = vadd.f32 %v92_v50, %v91_v41  ;;  %v106_v58 = vrot.slane %v105_v51, 1  ;;  %v132_v59 = vrot.slane %v131_v21, 2  ;;  %v159_v60 = vadd.f32 %v158_v52, %v157_v49 }
  0x2b   :  { %428 = vmatprep.mubr.bf16.mxu0 %v297_v18  ;;  %v120_v22 = vrot.slane %v119_v53, 1  ;;  %v146_v61 = vrot.slane %v145_v54, 2  ;;  %v188_v62 = vpack.c.bf16 %v172_v55, %v172_v55  ;;  %v190_v63 = vpack.c.bf16 %v174_v56, %v174_v56 }
  0x2c   :  { %v107_v0 = vadd.f32 %v106_v58, %v105_v51  ;;  %v133_v1 = vadd.f32 %v132_v59, %v131_v21  ;;  %v160_v2 = vrot.slane %v159_v60, 2  ;;  %v176_v23 = vmul.f32 0.25, %v93_v57  ;;  %642 = vmatpush3.bf16.msra.mxu1 %v672_v45 }
  0x2d   :  { %v121_v3 = vadd.f32 %v120_v22, %v119_v53  ;;  %v147_v4 = vadd.f32 %v146_v61, %v145_v54  ;;  %v259_v6 = vunpack.c.l.b16 %v188_v62  ;;  %v261_v7 = vunpack.c.l.b16 %v190_v63 }
  0x2e   :  { %v134_v8 = vrot.slane %v133_v1, 1  ;;  %v161_v9 = vadd.f32 %v160_v2, %v159_v60  ;;  %v178_v10 = vmul.f32 0.25, %v107_v0  ;;  %v192_v11 = vpack.c.bf16 %v176_v23, %v176_v23 }
  0x2f   :  { %v148_v12 = vrot.slane %v147_v4, 1  ;;  %v180_v13 = vmul.f32 0.25, %v121_v3  ;;  %v276_v14 = vsel %vm275_vm1, %v261_v7, %v259_v6 }
  0x30   :  { %v135_v15 = vadd.f32 %v134_v8, %v133_v1  ;;  %v162_v16 = vrot.slane %v161_v9, 1  ;;  %v194_v36 = vpack.c.bf16 %v178_v10, %v178_v10  ;;  %v263_v42 = vunpack.c.l.b16 %v192_v11 }
  0x31   :  { %v149_v19 = vadd.f32 %v148_v12, %v147_v4  ;;  %v196_v24 = vpack.c.bf16 %v180_v13, %v180_v13 }
  0x32   :  { %v163_v25 = vadd.f32 %v162_v16, %v161_v9  ;;  %v182_v26 = vmul.f32 0.25, %v135_v15  ;;  %v265_v27 = vunpack.c.l.b16 %v194_v36  ;;  %v278_v38 = vsel %vm277_vm2, %v263_v42, %v276_v14 }
  0x33   :  { %v184_v44 = vmul.f32 0.25, %v149_v19  ;;  %v267_v17 = vunpack.c.l.b16 %v196_v24 }
  0x34   :  { %v186_v28 = vmul.f32 0.25, %v163_v25  ;;  %v198_v29 = vpack.c.bf16 %v182_v26, %v182_v26  ;;  %v280_v30 = vsel %vm279_vm3, %v265_v27, %v278_v38 }
  0x35   :  { %v200_v31 = vpack.c.bf16 %v184_v44, %v184_v44  ;;  %v282_v32 = vsel %vm281_vm4, %v267_v17, %v280_v30 }
  0x36   :  { %v202_v33 = vpack.c.bf16 %v186_v28, %v186_v28  ;;  %v269_v34 = vunpack.c.l.b16 %v198_v29 }
  0x37   :  { %v271_v35 = vunpack.c.l.b16 %v200_v31 }
  0x38   :  { %v273_v18 = vunpack.c.l.b16 %v202_v33  ;;  %v284_v37 = vsel %vm283_vm5, %v269_v34, %v282_v32 }
  0x39   :  { %v286_v39 = vsel %vm285_vm6, %v271_v35, %v284_v37 }
  0x3a   :  { %v288_v40 = vsel %vm287_vm7, %v273_v18, %v286_v39 }
  0x3b   :  { %v296_v41 = vpack.c.b16 %v288_v40, %v288_v40 }
  0x3d   :  { %429 = vmatmul.mubr.bf16.vlgmr.msra.gmra.mxu0 %v296_v41 }
  0xfd   :  { %v612_v20 = vpop.f32.mrf.mxu0 }
  0xff   :  { %v613_v47 = vpop.f32.mrf.mxu0 }
 0x100   :  { %v614_v48 = vadd.f32 %v613_v47, %v612_v20 }
 0x101   :  { %v615_v49 = vpop.f32.mrf.mxu0 }
 0x102   :  { %v431_v50 = vadd.f32 %v614_v48, %v552_v46 }
 0x103   :  { %v616_v51 = vpop.f32.mrf.mxu0 }
 0x104   :  { %v436_v21 = vpack.c.bf16 %v431_v50, %v431_v50 }
 0x106   :  { %644 = vmatmul.mubr.bf16.vlgmr.msra.gmra.mxu1 %v436_v21 }
 0x1c6   :  { %v535_v52 = vpop.f32.mrf.mxu1 }
 0x1c7   :  { %v541_v53 = vmul.f32 %v535_v52, %v535_v52 }
 0x1c8   :  { %v645_v54 = vpop.f32.mrf.mxu1 }
 0x1c9   :  { %542 = vadd.xlane.f32.xlu0 %v541_v53 }
 0x1ca   :  { %v538_v55 = vpop.f32.mrf.mxu1 }
 0x1cc   :  { %v646_v56 = vpop.f32.mrf.mxu1 }
 0x252   :  { %v543_v57 = vpop.xlane.xlu0 %542 }
 0x253   :  { %v544_v5 = vadd.f32 1e-12, %v543_v57 }
 0x255   :  { %673 = vrsqrt.f32 %v544_v5 }
 0x262   :  { %v674_v58 = vpop.eup %673 }
 0x263   :  { %v546_v59 = vmul.f32 %v674_v58, %v535_v52 }
 0x265   :  { %547 = vst [vmem:[%s877_s4] sm:$0xff] %v546_v59 }

</bundles_post_ra>
